<compile_context>
chip_gen: v7x
topology: tpu7x:2x2x1
jax: 0.10.0
libtpu: 0.0.40
codegen_flags: <defaults>
</compile_context>

<pallas_src>
import functools

import jax
import jax.numpy as jnp
from jax.experimental import pallas as pl
from jax.experimental.pallas import tpu as pltpu


def _round_up(a, m):
    return ((a + m - 1) // m) * m


def causal_conv_kernel(x_ref, w_ref, o_ref, cols_ref, *, K, P, L_out):
    # x_ref:    (Bt, T, C_in)           un-padded input tile (Bt batch elems)
    # w_ref:    (KC_pad, C_out_pad)     im2col weight; row K*C_in holds the bias,
    #                                   remaining pad rows are zero
    # o_ref:    (Bt*L_out_pad, C_out_pad) lane/sublane-dense output slab
    # cols_ref: (Bt*L_out_pad, KC_pad)  VMEM scratch for the im2col matrix
    Bt, T, C_in = x_ref.shape
    KC = K * C_in
    KC_pad = w_ref.shape[0]
    M = o_ref.shape[0]
    L_out_pad = M // Bt

    # Initialize cols: zeros everywhere except the bias ("ones") column.
    # One full-tile aligned store (VPU select on an iota), no per-column writes.
    lane = jax.lax.broadcasted_iota(jnp.int32, (M, KC_pad), 1)
    cols_ref[...] = jnp.where(lane == KC, 1.0, 0.0).astype(cols_ref.dtype)

    # Scatter the K shifted views into the scratch at static offsets.
    # cols[b*L_out_pad + j, k*C_in + c] == x_padded[b, j + k, c], where
    # x_padded has P zero rows prepended (those rows stay zero from the init).
    for b in range(Bt):                    # Bt is small & static -> unrolled
        xb = x_ref[b]                      # (T, C_in)
        row0 = b * L_out_pad
        for k in range(K):                 # K is small & static -> unrolled
            z = max(P - k, 0)              # leading halo (zero) rows for tap k
            take = L_out - z               # valid rows for tap k
            if take <= 0:
                continue                   # fully inside the halo: stays zero
            s = max(k - P, 0)              # start row in the un-padded input
            cols_ref[row0 + z:row0 + z + take,
                     k * C_in:(k + 1) * C_in] = xb[s:s + take, :]

    # Single MXU matmul with f32 accumulation (bias folded in as a weight row).
    acc = jnp.dot(cols_ref[...], w_ref[...], preferred_element_type=jnp.float32)
    o_ref[...] = acc.astype(o_ref.dtype)


def causal_conv_pallas(x, weight, bias, padding, *, target_m=256):
    """x: (B, T, C_in); weight: (C_out, C_in, K) [PyTorch layout]; bias: (C_out,)."""
    B, T, C_in = x.shape
    C_out, _, K = weight.shape
    P = padding
    assert P >= 1, "module slices [:, :, :-P]; needs P >= 1"

    L_out = T + P - K + 1                 # (T + 2P - K + 1) - P
    assert L_out >= 1, f"non-positive output length {L_out}"

    # Tile/pad sizes (f32: 8 sublanes, 128 lanes).
    L_out_pad = _round_up(L_out, 8)       # sublane-aligned output rows per elem
    C_out_pad = _round_up(C_out, 128)     # lane-dense output channels
    KC = K * C_in
    KC_pad = _round_up(KC + 1, 8)         # +1 row for the folded bias

    # Batch tile: fill the MXU M dimension (target ~256) but keep at least
    # 2 grid steps when B >= 2 so v7x's two TensorCores both get work.
    Bt = max(1, min(B, target_m // L_out_pad))
    while Bt > 1 and -(-B // Bt) < 2:
        Bt = (Bt + 1) // 2
    num_steps = -(-B // Bt)
    B_pad = num_steps * Bt
    if B_pad != B:
        x = jnp.pad(x, ((0, B_pad - B), (0, 0), (0, 0)))

    # (C_out, C_in, K) -> (K, C_in, C_out) -> (K*C_in, C_out),
    # append the bias as one extra contraction row, then pad to tile sizes.
    w2 = jnp.transpose(weight, (2, 1, 0)).reshape(KC, C_out)
    w2 = jnp.concatenate([w2, bias[None, :]], axis=0)              # (KC+1, C_out)
    w2 = jnp.pad(w2, ((0, KC_pad - (KC + 1)), (0, C_out_pad - C_out)))

    M_tile = Bt * L_out_pad

    out = pl.pallas_call(
        functools.partial(causal_conv_kernel, K=K, P=P, L_out=L_out),
        out_shape=jax.ShapeDtypeStruct((B_pad * L_out_pad, C_out_pad), x.dtype),
        grid_spec=pltpu.PrefetchScalarGridSpec(
            num_scalar_prefetch=0,
            grid=(num_steps,),
            in_specs=[
                pl.BlockSpec((Bt, T, C_in), lambda b: (b, 0, 0)),        # x tile
                pl.BlockSpec((KC_pad, C_out_pad), lambda b: (0, 0)),     # weight
            ],
            out_specs=pl.BlockSpec((M_tile, C_out_pad), lambda b: (b, 0)),
            scratch_shapes=[pltpu.VMEM((M_tile, KC_pad), x.dtype)],      # im2col
        ),
        compiler_params=pltpu.CompilerParams(
            dimension_semantics=("parallel",),
        ),
    )(x, w2)

    # Undo the padding outside the kernel (cheap reshape + slice).
    out = out.reshape(B_pad, L_out_pad, C_out_pad)
    return out[:B, :L_out, :C_out]


def causal_conv_ref(x, weight, bias, padding):
    """Pure-JAX reference mirroring PyTorch Conv1d(padding=P) + drop-last-P."""
    B, T, C_in = x.shape
    C_out, _, K = weight.shape
    P = padding
    L_out = T + P - K + 1
    x_pad = jnp.pad(x, ((0, 0), (P, 0), (0, 0)))   # only the left halo is read
    ys = [jnp.einsum("btc,oc->bto", x_pad[:, k:k + L_out, :], weight[:, :, k])
          for k in range(K)]
    return sum(ys) + bias[None, None, :]


if __name__ == "__main__":
    key = jax.random.PRNGKey(0)

    # Config 1: small shapes consistent with the module (causal conv, P = K-1).
    B, T, C_in, C_out, K = 2, 16, 4, 8, 3
    P = K - 1
    kx, kw, kb, key = (*jax.random.split(key, 3), key)
    x = jax.random.normal(kx, (B, T, C_in), dtype=jnp.float32)
    weight = jax.random.normal(kw, (C_out, C_in, K), dtype=jnp.float32) * 0.1
    bias = jax.random.normal(kb, (C_out,), dtype=jnp.float32) * 0.1

    y = jax.block_until_ready(causal_conv_pallas(x, weight, bias, P))
    y_ref = causal_conv_ref(x, weight, bias, P)
    assert y.shape == (B, T + P - K + 1, C_out), y.shape
    assert jnp.allclose(y, y_ref, atol=1e-5, rtol=1e-5), "mismatch vs reference (cfg 1)"

    # Config 2: exercises P > K-1, ragged L_out (sublane pad), odd B (batch pad),
    # and Bt > 1 (multiple batch elements folded into one matmul).
    B2, T2, C_in2, C_out2, K2, P2 = 5, 12, 4, 8, 3, 4
    kx2, kw2, kb2 = jax.random.split(key, 3)
    x2 = jax.random.normal(kx2, (B2, T2, C_in2), dtype=jnp.float32)
    w2 = jax.random.normal(kw2, (C_out2, C_in2, K2), dtype=jnp.float32) * 0.1
    b2 = jax.random.normal(kb2, (C_out2,), dtype=jnp.float32) * 0.1

    y2 = jax.block_until_ready(causal_conv_pallas(x2, w2, b2, P2))
    y2_ref = causal_conv_ref(x2, w2, b2, P2)
    assert y2.shape == (B2, T2 + P2 - K2 + 1, C_out2), y2.shape
    assert jnp.allclose(y2, y2_ref, atol=1e-5, rtol=1e-5), "mismatch vs reference (cfg 2)"

    print("KERNEL_OK")
</pallas_src>

<mosaic_0001>
module attributes {stable_mosaic.version = 11 : i64} {
  func.func @causal_conv_kernel(%arg0: i32, %arg1: memref<1x16x4xf32, #tpu.memory_space<vmem>>, %arg2: memref<16x128xf32, #tpu.memory_space<vmem>>, %arg3: memref<16x128xf32, #tpu.memory_space<vmem>>, %arg4: memref<16x16xf32, #tpu.memory_space<vmem>>) attributes {dimension_semantics = [#tpu.dimension_semantics<parallel>], iteration_bounds = array<i64: 2>, scalar_prefetch = 0 : i64, scratch_operands = 1 : i64, tpu.core_type = #tpu.core_type<tc>, window_params = [{transform_indices = @transform_0, window_bounds = array<i64: 1, 16, 4>}, {pipeline_mode = #tpu.pipeline_mode<synchronous>, transform_indices = @transform_1, window_bounds = array<i64: 16, 128>}, {transform_indices = @transform_2, window_bounds = array<i64: 16, 128>}]} {
    %0 = tpu.iota {dimensions = array<i32: 1>} : vector<16x16xi32>
    %c12_i32 = arith.constant 12 : i32
    %1 = vector.broadcast %c12_i32 : i32 to vector<16x16xi32>
    %2 = arith.cmpi eq, %0, %1 : vector<16x16xi32>
    %cst = arith.constant 1.000000e+00 : f32
    %cst_0 = arith.constant 0.000000e+00 : f32
    %3 = vector.broadcast %cst : f32 to vector<16x16xf32>
    %4 = vector.broadcast %cst_0 : f32 to vector<16x16xf32>
    %5 = arith.select %2, %3, %4 : vector<16x16xi1>, vector<16x16xf32>
    %c0 = arith.constant 0 : index
    %c0_1 = arith.constant 0 : index
    %6 = vector.load %arg4[%c0, %c0_1] : memref<16x16xf32, #tpu.memory_space<vmem>>, vector<16x16xf32>
    tpu.vector_store %arg4[%c0, %c0_1], %5 {strides = array<i32>} : memref<16x16xf32, #tpu.memory_space<vmem>>, vector<16x16xf32>,
    %c0_2 = arith.constant 0 : index
    %c0_3 = arith.constant 0 : index
    %c0_4 = arith.constant 0 : index
    %7 = vector.load %arg1[%c0_2, %c0_3, %c0_4] : memref<1x16x4xf32, #tpu.memory_space<vmem>>, vector<1x16x4xf32>
    %8 = vector.shape_cast %7 : vector<1x16x4xf32> to vector<16x4xf32>
    %9 = vector.extract_strided_slice %8 {offsets = [0, 0], sizes = [14, 4], strides = [1, 1]} : vector<16x4xf32> to vector<14x4xf32>
    %c2 = arith.constant 2 : index
    %c0_5 = arith.constant 0 : index
    %10 = vector.load %arg4[%c2, %c0_5] : memref<16x16xf32, #tpu.memory_space<vmem>>, vector<14x4xf32>
    tpu.vector_store %arg4[%c2, %c0_5], %9 {strides = array<i32>} : memref<16x16xf32, #tpu.memory_space<vmem>>, vector<14x4xf32>,
    %11 = vector.extract_strided_slice %8 {offsets = [0, 0], sizes = [15, 4], strides = [1, 1]} : vector<16x4xf32> to vector<15x4xf32>
    %c1 = arith.constant 1 : index
    %c4 = arith.constant 4 : index
    %12 = vector.load %arg4[%c1, %c4] : memref<16x16xf32, #tpu.memory_space<vmem>>, vector<15x4xf32>
    tpu.vector_store %arg4[%c1, %c4], %11 {strides = array<i32>} : memref<16x16xf32, #tpu.memory_space<vmem>>, vector<15x4xf32>,
    %c0_6 = arith.constant 0 : index
    %c8 = arith.constant 8 : index
    %13 = vector.load %arg4[%c0_6, %c8] : memref<16x16xf32, #tpu.memory_space<vmem>>, vector<16x4xf32>
    tpu.vector_store %arg4[%c0_6, %c8], %8 {strides = array<i32>} : memref<16x16xf32, #tpu.memory_space<vmem>>, vector<16x4xf32>,
    %c0_7 = arith.constant 0 : index
    %c0_8 = arith.constant 0 : index
    %14 = vector.load %arg4[%c0_7, %c0_8] : memref<16x16xf32, #tpu.memory_space<vmem>>, vector<16x16xf32>
    %c0_9 = arith.constant 0 : index
    %c0_10 = arith.constant 0 : index
    %15 = vector.load %arg2[%c0_9, %c0_10] : memref<16x128xf32, #tpu.memory_space<vmem>>, vector<16x128xf32>
    %cst_11 = arith.constant dense<0.000000e+00> : vector<16x128xf32>
    %16 = tpu.matmul %14, %15, %cst_11 {dimension_numbers = #tpu.dot_dimension_numbers<[1], [0], [0], [1], [0, 0, 1, 1], [], []>} : vector<16x16xf32>, vector<16x128xf32>, vector<16x128xf32> -> vector<16x128xf32>
    %c0_12 = arith.constant 0 : index
    %c0_13 = arith.constant 0 : index
    %17 = vector.load %arg3[%c0_12, %c0_13] : memref<16x128xf32, #tpu.memory_space<vmem>>, vector<16x128xf32>
    tpu.vector_store %arg3[%c0_12, %c0_13], %16 {strides = array<i32>} : memref<16x128xf32, #tpu.memory_space<vmem>>, vector<16x128xf32>,
    return
  }
  func.func @transform_0(%arg0: i32) -> (i32, i32, i32) {
    %c0_i32 = arith.constant 0 : i32
    %c0_i32_0 = arith.constant 0 : i32
    %c0_i32_1 = arith.constant 0 : i32
    return %arg0, %c0_i32, %c0_i32_0 : i32, i32, i32
  }
  func.func @transform_1(%arg0: i32) -> (i32, i32) {
    %c0_i32 = arith.constant 0 : i32
    %c0_i32_0 = arith.constant 0 : i32
    %c0_i32_1 = arith.constant 0 : i32
    return %c0_i32, %c0_i32_0 : i32, i32
  }
  func.func @transform_2(%arg0: i32) -> (i32, i32) {
    %c0_i32 = arith.constant 0 : i32
    %c0_i32_0 = arith.constant 0 : i32
    return %arg0, %c0_i32 : i32, i32
  }
}

</mosaic_0001>

<bundles_post_ra>
// kernel: tpu_custom_call.1
= control target key start
LH: loop header
LB: loop body
LE: loop exit
PB: predicated region body
PF: predicated region fallthrough
CT: control target
= control target key end

     0   :  { %7 = vsyncpa [#allocation4], 0  ;;  %s614_s0 = inlined_call_operand.vmem [shape: f32[2,16,4], index: 0, kind: input, shape index: {}]   ;;  %s615_s1 = inlined_call_operand.vmem [shape: f32[16,128], index: 1, kind: input, shape index: {}]   ;;  %s616_s2 = inlined_call_operand.hbm [shape: f32[32,128], index: 2, kind: output, shape index: {}]  }
   0x1   :  { %9 = vsyncpa [#allocation4 + $0x1], 0  ;;  %s498_s9 = smov 0   ;;  %s500_s10 = smov 0  }
   0x2   :  { %s502_s11 = smov 0   ;;  %s504_s12 = smov 0  }
   0x3 LB: > { %s519_s13 = sadd.s32 4294967295, %s476_s12   ;;  %s340_s14 = sadd.s32 4294967294, %s476_s12   ;;  %s476_s12 = sphi %s504_s12, %s622_s12   ;;  %s472_s11 = sphi %s502_s11, %s621_s11   ;;  %s468_s10 = sphi %s500_s10, %s620_s10   ;;  %s464_s9 = sphi %s498_s9, %s619_s9  }
   0x4   : > { %s523_s15 = sadd.s32 1, %s476_s12   ;;  %s69_s16 = sadd.s32 1, %s472_s11 }
   0x5   : > { %s66_s17 = ssub.s32 %s476_s12, %s523_s15  ;;  %p79_p0 = scmp.ne.s32.totalorder %s472_s11, %s468_s10 }
   0x6   : > { %p67_p1 = scmp.eq.s32.totalorder %s66_s17, 0  ;;  %p80_p2 = scmp.eq.s32.totalorder %s519_s13, 1 }
   0x7   : > { %p85_p3 = scmp.ne.s32.totalorder %s468_s10, %s464_s9  ;;  %p86_p4 = scmp.eq.s32.totalorder %s340_s14, 1 }
   0x8   : > { %s534_s18 = scalar_select %p67_p1, %s472_s11, %s69_s16  }
   0x9   : > { %p536_p5 = por %p80_p2, %p79_p0  ;;  %p540_p6 = por %p86_p4, %p85_p3 }
   0xa   : > { %p343_p7 = scmp.ge.s32.totalorder %s476_s12, 1  ;;  %p115_p8 = scmp.lt.s32.totalorder %s476_s12, 3 }
   0xc   : > { %p116_p9 = pnand %p343_p7, %p115_p8 }
   0xd   : > { %p137_p10 = scmp.lt.s32.totalorder (!%p116_p9), %s519_s13, 1  ;;  %v143_v0 = vlaneseq (!%p116_p9)  ;;  %v179_v1 = vld [vmem:[%s615_s1] sm:$0xff] (!%p116_p9)  ;;  %v180_v2 = vld [vmem:[%s615_s1 + $0x8] sm:$0xff] (!%p116_p9)  ;;  %vm147_vm0 = vcmask (!%p116_p9), 130048   ;;  %vm152_vm2 = vcmask (!%p116_p9), 31744   ;;  %vm154_vm3 = vcmask (!%p116_p9), 29696  }
   0xe   : > { %119 = sbr.rel (%p116_p9) target bundleno = 382 (0x17e), region = 28  ;;  %v367_v4 = vpack.c.bf16 (!%p116_p9), %v180_v2, %v179_v1  ;;  %v478_v5 = vmov (!%p116_p9), 0.0   ;;  %s479_s30 = smov (!%p116_p9), 4   ;;  %vm164_vm4 = vcmask (!%p116_p9), 64544   ;;  %vm174_vm5 = vcmask (!%p116_p9), 97344  }
   0xf   : > { %v144_v3 = vand.u32 (!%p116_p9), 127, %v143_v0  ;;  %s480_s3 = smov (!%p116_p9), 8   ;;  %vm166_vm6 = vcmask (!%p116_p9), 63520   ;;  %s134_s4 = sand.u32 (!%p116_p9), 1, %s468_s10  }
  0x10   : > { %368 = vmatprep.subr.bf16.mxu0 (!%p116_p9), %v367_v4  ;;  %s344_s5 = sshll.u32 (!%p116_p9), %s134_s4, 4  ;;  %s355_s8 = sshll.u32 (!%p116_p9), %s519_s13, 8 }
  0x11   : > { %vm145_vm1 = vcmp.eq.s32.totalorder (!%p116_p9), %v144_v3, 12  ;;  %370 = vmatpush3.bf16.msra.mxu0 (!%p116_p9), %v367_v4  ;;  %s136_s6 = scalar_lea.vmem (!%p116_p9), [#allocation3], %s344_s5  ;;  %s570_s17 = scalar_lea.hbm (!%p116_p9), %s616_s2, %s355_s8 }
  0x12   : > { %v146_v6 = vsel (!%p116_p9), %vm145_vm1, 1.0, %v478_v5  ;;  %s278_s7 = sshll.u32 (!%p116_p9), %s136_s6, 4  ;;  %s572_s21 = scalar_lea.sflag (!%p116_p9), [#allocation4], %s134_s4  ;;  %s565_s7 = int_to_ptr.vmem [resolvable:$true] %s278_s7 }
  0x13   : > { %148 = vst.msk [vmem:[#allocation2] sm:$0xff] (!%p116_p9), %vm147_vm0, %v146_v6  ;;  %149 = vst.msk [vmem:[#allocation2 + $0x8] sm:$0xff] (!%p116_p9), %vm147_vm0, %v146_v6  ;;  %s414_s22 = scalar_lea.vmem (!%p116_p9), %s565_s7, 256 }
  0x14   : > { %p415_p11 = scmp.ne.s32.totalorder (!%p116_p9), %s565_s7, %s414_s22 }
  0x15   : > { %s138_s25 = scalar_select %p137_p10, %s519_s13, 1 }
  0x16   : > { %p416_p12 = pnand %p415_p11, %p536_p5  ;;  %s481_s13 = smov [#allocation3]  }
  0x17   : > { %s354_s26 = sshll.u32 %s138_s25, 4  ;;  %s418_s23 = sshll.u32 %s481_s13, 4  ;;  %s419_s23 = int_to_ptr.vmem [resolvable:$false] %s418_s23 }
  0x18   : > { %s141_s29 = scalar_lea.vmem %s614_s0, %s354_s26  ;;  %p417_p13 = pneg %p416_p12 }
  0x19   : > { %v150_v7 = vld [vmem:[%s141_s29] sm:$0xff]  ;;  %v151_v8 = vld [vmem:[%s141_s29 + $0x8] sm:$0xff]  ;;  %s420_s24 = scalar_lea.vmem %s419_s23, 512  ;;  %p421_p0 = scmp.lt.s32.totalorder %s565_s7, %s419_s23 }
  0x1a   : > { %158 = vrot.lane.b32.xlu0 %v150_v7, %s479_s30  ;;  %168 = vrot.lane.b32.xlu1 %v150_v7, %s480_s3  ;;  %153 = vst.msk [vmem:[#allocation2 + $0x2] sm:$0xff] %vm152_vm2, %v150_v7  ;;  %p422_p1 = scmp.lt.s32.totalorder %s420_s24, %s414_s22 }
  0x1b   : > { %155 = vst.msk [vmem:[#allocation2 + $0xa] sm:$0x3f] %vm154_vm3, %v151_v8 }
  0x1c   : > { %p423_p2 = por %p422_p1, %p421_p0 }
  0x1e   : > { %160 = vrot.lane.b32.xlu0 %v151_v8, %s479_s30  ;;  %170 = vrot.lane.b32.xlu1 %v151_v8, %s480_s3  ;;  %p424_p3 = pnand %p423_p2, %p417_p13 }
  0x8c   : > { %v159_v9 = vpop.permute.xlu0 %158  ;;  %v169_v10 = vpop.permute.xlu1 %168 }
  0x8d   : > { %165 = vst.msk [vmem:[#allocation2 + $0x1] sm:$0xff] %vm164_vm4, %v159_v9 }
  0x8e   : > { %175 = vst.msk [vmem:[#allocation2] sm:$0xff] %vm174_vm5, %v169_v10 }
  0x90   : > { %v161_v11 = vpop.permute.xlu0 %160  ;;  %v171_v12 = vpop.permute.xlu1 %170 }
  0x91   : > { %167 = vst.msk [vmem:[#allocation2 + $0x9] sm:$0x7f] %vm166_vm6, %v161_v11 }
  0x92   : > { %176 = vst.msk [vmem:[#allocation2 + $0x8] sm:$0xff] %vm174_vm5, %v171_v12 }
  0x95   : > { %v177_v13 = vld [vmem:[#allocation2] sm:$0xff] }
  0x96   : > { %364 = vmatprep.mubr.msk.f32.mxu0 %vm147_vm0, %v177_v13 }
  0x99   : > { %v178_v14 = vld [vmem:[#allocation2 + $0x8] sm:$0xff] }
  0x9a   : > { %365 = vmatmul.mubr.msk.f32.vlgmr.msra.gmra.mrb[0].mxu0 %vm147_vm0, %v178_v14 }
 0x16d   : > { %v366_v15 = vpop.f32.mrb[0].mxu0 }
 0x16e   : > { %263 = vst [vmem:[%s136_s6 + $0x8] sm:$0xff] %v366_v15  ;;  %v253_v16 = vpop.f32.mrb[1].mxu0 }
 0x16f   : > { %262 = vst [vmem:[%s136_s6] sm:$0xff] %v253_v16 }
 0x170   : > { %427 = shalt.err (!%p424_p3)
}
 0x171   : > { %s428_s25 = scalar_lea.hbm %s570_s17, 256  ;;  %s432_s28 = scalar_lea.hbm %s616_s2, 512 }
 0x172   : > { %p429_p4 = scmp.ne.s32.totalorder %s570_s17, %s428_s25  ;;  %p433_p9 = scmp.lt.u32.totalorder %s570_s17, %s616_s2 }
 0x173   : > { %p434_p10 = scmp.lt.u32.totalorder %s432_s28, %s428_s25  ;;  %p436_p12 = scmp.lt.u32.totalorder %s428_s25, %s570_s17 }
 0x174   : > { %p430_p7 = pnand %p429_p4, %p536_p5 }
 0x175   : > { %p435_p11 = por %p434_p10, %p433_p9 }
 0x176   : > { %p431_p8 = pneg %p430_p7 }
 0x177   : > { %p437_p13 = por %p436_p12, %p435_p11 }
 0x179   : > { %p438_p0 = pnand %p437_p13, %p431_p8 }
 0x17b   : > { %441 = shalt.err (!%p438_p0)
}
 0x17c   : > { %s482_s4 = smov 128  }
 0x17d   : > { %371 = dma.vmem_to_hbm [thread:$0]  (%p536_p5), %s565_s7, 256, %s570_s17, %s572_s21, %s482_s4, %s482_s4, %s480_s3  }
 0x17e PF: > { %p377_p1 = scmp.ge.s32.totalorder %s476_s12, 2  ;;  %s293_s5 = sand.u32 1, %s464_s9  }
 0x17f   : > { %s294_s6 = scalar_lea.sflag [#allocation4], %s293_s5 }
 0x180   : > { %p374_p2 = pnand %p377_p1, %p540_p6 }
 0x182   : > { %459 = dma.done.wait (!%p374_p2), %s294_s6, 256  }
 0x183   : > { %461 = vsyncadd (!%p374_p2), %s294_s6, 4294967040  ;;  %p12_p3 = scmp.ge.s32.totalorder %s523_s15, 4   ;;  %s619_s9 = smov %s468_s10 }
 0x184   : > { %s620_s10 = smov %s472_s11  ;;  %s621_s11 = smov %s534_s18 }
 0x185   : > { %s622_s12 = smov %s523_s15  ;;  %14 = sbr.rel (!%p12_p3) target bundleno = 3 (0x3), region = 63 }
 0x18c   :  { %299 = vsyncpa [#allocation4], 1 }
 0x18d   :  { %301 = vsyncpa [#allocation4 + $0x1], 1 }

</bundles_post_ra>
